<compile_context>
chip_gen: v7x
topology: tpu7x:2x2x1
jax: 0.10.0
libtpu: 0.0.40
codegen_flags: <defaults>
</compile_context>

<pallas_src>
import functools
import math

import jax
import jax.numpy as jnp
from jax.experimental import pallas as pl
from jax.experimental.pallas import tpu as pltpu


def _round_up(a, b):
    return (a + b - 1) // b * b


def adapter_kernel(x_ref, w_in_ref, b_in_ref, w2_ref, b2_ref,
                   gamma_ref, beta_ref, o_ref, *, hp):
    # x_ref: (tm, D_in) row tile in compute dtype (bf16).
    # w_in_ref: (D_in, hp + D_out) fused [Linear1 | Skip] weights (bf16).
    x = x_ref[...]

    # One wide MXU matmul covers both the bottleneck input proj and the skip.
    t = jnp.dot(x, w_in_ref[...], preferred_element_type=jnp.float32)
    t = t + b_in_ref[...]                       # f32 bias add (broadcast once)

    h = jnp.maximum(t[:, :hp], 0.0)             # bottleneck hidden (ReLU)
    s = t[:, hp:]                               # skip branch (lane-aligned split)

    y = jnp.dot(h.astype(w2_ref.dtype), w2_ref[...],
                preferred_element_type=jnp.float32) + b2_ref[...]
    z = y + s

    # LayerNorm over features (biased variance, eps=1e-5, like PyTorch), f32.
    mean = jnp.mean(z, axis=-1, keepdims=True)
    var = jnp.mean(jnp.square(z - mean), axis=-1, keepdims=True)
    zn = (z - mean) * jax.lax.rsqrt(var + 1e-5)
    o_ref[...] = (zn * gamma_ref[...] + beta_ref[...]).astype(o_ref.dtype)


def adapter_forward(x, params, *, compute_dtype=jnp.bfloat16, tm_max=512):
    """x: (batch, seq, input_dim) -> (batch, seq, output_dim)."""
    w1, b1, w2, b2, ws, bs, gamma, beta = params
    B, S, D_in = x.shape
    H = w1.shape[1]
    D_out = w2.shape[1]
    M = B * S

    # ---- weight prep (once per call; layout plumbing, not per grid step) ----
    # Pad the bottleneck width to a 128-lane boundary and fuse the two
    # matmuls that consume x:  x @ [w1_pad | w_skip].
    Hp = _round_up(H, 128)
    w1p = jnp.zeros((D_in, Hp), w1.dtype).at[:, :H].set(w1)
    b1p = jnp.zeros((1, Hp), b1.dtype).at[:, :H].set(b1)
    w2p = jnp.zeros((Hp, D_out), w2.dtype).at[:H, :].set(w2)

    Nf = Hp + D_out
    w_in = jnp.concatenate([w1p, ws], axis=1).astype(compute_dtype)   # (D_in, Nf)
    b_in = jnp.concatenate([b1p, bs], axis=1).astype(jnp.float32)     # (1,  Nf)
    w2c = w2p.astype(compute_dtype)                                   # (Hp, D_out)
    b2c = b2.astype(jnp.float32)
    gammac = gamma.astype(jnp.float32)
    betac = beta.astype(jnp.float32)

    # ---- row tiling: large tiles, zero-pad the ragged tail ----
    tm = min(tm_max, _round_up(M, 8))
    M_pad = _round_up(M, tm)
    x2 = x.reshape(M, D_in).astype(compute_dtype)
    if M_pad != M:
        x2 = jnp.pad(x2, ((0, M_pad - M), (0, 0)))

    out_dtype = x.dtype

    # ---- VMEM budget: double-buffered tiles + resident weights + f32 temps ----
    def nbytes(shape, dt):
        return math.prod(shape) * jnp.dtype(dt).itemsize

    est = (2 * (nbytes((tm, D_in), compute_dtype) + nbytes((tm, D_out), out_dtype))
           + 2 * (nbytes((D_in, Nf), compute_dtype) + nbytes((Hp, D_out), compute_dtype))
           + 2 * (nbytes((1, Nf), jnp.float32) + 3 * nbytes((1, D_out), jnp.float32))
           + nbytes((tm, Nf), jnp.float32) + 2 * nbytes((tm, D_out), jnp.float32))
    vmem_limit = int(min(max(2 * est, 8 * 1024 * 1024), 48 * 1024 * 1024))

    cost = pl.CostEstimate(
        flops=2 * M_pad * (D_in * Nf + Hp * D_out),
        transcendentals=0,
        bytes_accessed=(x2.size * jnp.dtype(compute_dtype).itemsize
                        + w_in.size * jnp.dtype(compute_dtype).itemsize
                        + w2c.size * jnp.dtype(compute_dtype).itemsize
                        + M_pad * D_out * jnp.dtype(out_dtype).itemsize),
    )

    full = lambda r, c: pl.BlockSpec((r, c), lambda i: (0, 0))

    out2 = pl.pallas_call(
        functools.partial(adapter_kernel, hp=Hp),
        out_shape=jax.ShapeDtypeStruct((M_pad, D_out), out_dtype),
        grid_spec=pltpu.PrefetchScalarGridSpec(
            num_scalar_prefetch=0,
            grid=(M_pad // tm,),
            in_specs=[
                pl.BlockSpec((tm, D_in), lambda i: (i, 0)),  # x row tile
                full(D_in, Nf),     # fused [w1_pad | w_skip]
                full(1, Nf),        # fused [b1_pad | b_skip]
                full(Hp, D_out),    # w2 (padded rows are zero)
                full(1, D_out),     # b2
                full(1, D_out),     # gamma
                full(1, D_out),     # beta
            ],
            out_specs=pl.BlockSpec((tm, D_out), lambda i: (i, 0)),
        ),
        compiler_params=pltpu.CompilerParams(
            dimension_semantics=("parallel",),
            vmem_limit_bytes=vmem_limit),
        cost_estimate=cost,
    )(x2, w_in, b_in, w2c, b2c, gammac, betac)

    return out2[:M].reshape(B, S, D_out)


def init_params(key, input_dim, hidden_dim, output_dim):
    """Deterministic synthetic parameters (weights stored as (in, out))."""
    ks = jax.random.split(key, 6)
    scale1 = 1.0 / jnp.sqrt(input_dim)
    scale2 = 1.0 / jnp.sqrt(hidden_dim)
    w1 = jax.random.uniform(ks[0], (input_dim, hidden_dim), jnp.float32, -scale1, scale1)
    b1 = jax.random.uniform(ks[1], (1, hidden_dim), jnp.float32, -scale1, scale1)
    w2 = jax.random.uniform(ks[2], (hidden_dim, output_dim), jnp.float32, -scale2, scale2)
    b2 = jax.random.uniform(ks[3], (1, output_dim), jnp.float32, -scale2, scale2)
    ws = jax.random.uniform(ks[4], (input_dim, output_dim), jnp.float32, -scale1, scale1)
    bs = jax.random.uniform(ks[5], (1, output_dim), jnp.float32, -scale1, scale1)
    gamma = jnp.ones((1, output_dim), jnp.float32)
    beta = jnp.zeros((1, output_dim), jnp.float32)
    return (w1, b1, w2, b2, ws, bs, gamma, beta)


def adapter_ref(x, params):
    """Pure-JAX f32 reference of the same forward pass."""
    w1, b1, w2, b2, ws, bs, gamma, beta = params
    h = jnp.maximum(x @ w1 + b1, 0.0)
    y = h @ w2 + b2
    s = x @ ws + bs
    z = y + s
    mean = jnp.mean(z, axis=-1, keepdims=True)
    var = jnp.mean((z - mean) ** 2, axis=-1, keepdims=True)
    return (z - mean) * jax.lax.rsqrt(var + 1e-5) * gamma + beta


if __name__ == "__main__":
    # Small shapes consistent with the module's Linear stack
    # (input_dim -> hidden_dim -> output_dim) + skip + LayerNorm.
    batch, seq = 2, 8
    input_dim, hidden_dim, output_dim = 128, 64, 128

    key = jax.random.PRNGKey(0)
    kx, kp = jax.random.split(key)
    x = jax.random.normal(kx, (batch, seq, input_dim), jnp.float32)
    params = init_params(kp, input_dim, hidden_dim, output_dim)

    out = adapter_forward(x, params)
    out = jax.block_until_ready(out)

    ref = adapter_ref(x, params)
    assert out.shape == (batch, seq, output_dim)
    # Matmuls run in bf16 (f32 accumulation), so compare with a bf16-level
    # tolerance against the f32 reference.
    assert jnp.allclose(out, ref, atol=5e-2, rtol=5e-2), "mismatch vs reference"

    print("KERNEL_OK")
</pallas_src>

<mosaic_0001>
module attributes {stable_mosaic.version = 11 : i64} {
  func.func @adapter_kernel(%arg0: i32, %arg1: memref<16x128xbf16, #tpu.memory_space<vmem>>, %arg2: memref<128x256xbf16, #tpu.memory_space<vmem>>, %arg3: memref<1x256xf32, #tpu.memory_space<vmem>>, %arg4: memref<128x128xbf16, #tpu.memory_space<vmem>>, %arg5: memref<1x128xf32, #tpu.memory_space<vmem>>, %arg6: memref<1x128xf32, #tpu.memory_space<vmem>>, %arg7: memref<1x128xf32, #tpu.memory_space<vmem>>, %arg8: memref<16x128xf32, #tpu.memory_space<vmem>>) attributes {dimension_semantics = [#tpu.dimension_semantics<parallel>], iteration_bounds = array<i64: 1>, scalar_prefetch = 0 : i64, scratch_operands = 0 : i64, tpu.core_type = #tpu.core_type<tc>, window_params = [{transform_indices = @transform_0, window_bounds = array<i64: 16, 128>}, {pipeline_mode = #tpu.pipeline_mode<synchronous>, transform_indices = @transform_1, window_bounds = array<i64: 128, 256>}, {pipeline_mode = #tpu.pipeline_mode<synchronous>, transform_indices = @transform_2, window_bounds = array<i64: 1, 256>}, {pipeline_mode = #tpu.pipeline_mode<synchronous>, transform_indices = @transform_3, window_bounds = array<i64: 128, 128>}, {pipeline_mode = #tpu.pipeline_mode<synchronous>, transform_indices = @transform_4, window_bounds = array<i64: 1, 128>}, {pipeline_mode = #tpu.pipeline_mode<synchronous>, transform_indices = @transform_5, window_bounds = array<i64: 1, 128>}, {pipeline_mode = #tpu.pipeline_mode<synchronous>, transform_indices = @transform_6, window_bounds = array<i64: 1, 128>}, {transform_indices = @transform_7, window_bounds = array<i64: 16, 128>}]} {
    %c0 = arith.constant 0 : index
    %c0_0 = arith.constant 0 : index
    %0 = vector.load %arg1[%c0, %c0_0] : memref<16x128xbf16, #tpu.memory_space<vmem>>, vector<16x128xbf16>
    %c0_1 = arith.constant 0 : index
    %c0_2 = arith.constant 0 : index
    %1 = vector.load %arg2[%c0_1, %c0_2] : memref<128x256xbf16, #tpu.memory_space<vmem>>, vector<128x256xbf16>
    %cst = arith.constant dense<0.000000e+00> : vector<16x256xf32>
    %2 = tpu.matmul %0, %1, %cst {dimension_numbers = #tpu.dot_dimension_numbers<[1], [0], [0], [1], [0, 0, 1, 1], [], []>} : vector<16x128xbf16>, vector<128x256xbf16>, vector<16x256xf32> -> vector<16x256xf32>
    %c0_3 = arith.constant 0 : index
    %c0_4 = arith.constant 0 : index
    %3 = vector.load %arg3[%c0_3, %c0_4] : memref<1x256xf32, #tpu.memory_space<vmem>>, vector<1x256xf32>
    %4 = vector.broadcast %3 : vector<1x256xf32> to vector<16x256xf32>
    %5 = arith.addf %2, %4 : vector<16x256xf32>
    %6 = vector.extract_strided_slice %5 {offsets = [0, 0], sizes = [16, 128], strides = [1, 1]} : vector<16x256xf32> to vector<16x128xf32>
    %cst_5 = arith.constant 0.000000e+00 : f32
    %7 = vector.broadcast %cst_5 : f32 to vector<16x128xf32>
    %8 = arith.maximumf %6, %7 : vector<16x128xf32>
    %9 = vector.extract_strided_slice %5 {offsets = [0, 128], sizes = [16, 128], strides = [1, 1]} : vector<16x256xf32> to vector<16x128xf32>
    %10 = arith.truncf %8 : vector<16x128xf32> to vector<16x128xbf16>
    %c0_6 = arith.constant 0 : index
    %c0_7 = arith.constant 0 : index
    %11 = vector.load %arg4[%c0_6, %c0_7] : memref<128x128xbf16, #tpu.memory_space<vmem>>, vector<128x128xbf16>
    %cst_8 = arith.constant dense<0.000000e+00> : vector<16x128xf32>
    %12 = tpu.matmul %10, %11, %cst_8 {dimension_numbers = #tpu.dot_dimension_numbers<[1], [0], [0], [1], [0, 0, 1, 1], [], []>} : vector<16x128xbf16>, vector<128x128xbf16>, vector<16x128xf32> -> vector<16x128xf32>
    %c0_9 = arith.constant 0 : index
    %c0_10 = arith.constant 0 : index
    %13 = vector.load %arg5[%c0_9, %c0_10] : memref<1x128xf32, #tpu.memory_space<vmem>>, vector<1x128xf32>
    %14 = vector.broadcast %13 : vector<1x128xf32> to vector<16x128xf32>
    %15 = arith.addf %12, %14 : vector<16x128xf32>
    %16 = arith.addf %15, %9 : vector<16x128xf32>
    %cst_11 = arith.constant dense<0.000000e+00> : vector<16xf32>
    %17 = vector.multi_reduction <add>, %16, %cst_11 [1] : vector<16x128xf32> to vector<16xf32>
    %18 = vector.shape_cast %17 : vector<16xf32> to vector<16x1xf32>
    %cst_12 = arith.constant 1.280000e+02 : f32
    %19 = vector.broadcast %cst_12 : f32 to vector<16x1xf32>
    %20 = arith.divf %18, %19 : vector<16x1xf32>
    %21 = vector.broadcast %20 : vector<16x1xf32> to vector<16x128xf32>
    %22 = arith.subf %16, %21 : vector<16x128xf32>
    %23 = arith.mulf %22, %22 : vector<16x128xf32>
    %cst_13 = arith.constant dense<0.000000e+00> : vector<16xf32>
    %24 = vector.multi_reduction <add>, %23, %cst_13 [1] : vector<16x128xf32> to vector<16xf32>
    %25 = vector.shape_cast %24 : vector<16xf32> to vector<16x1xf32>
    %cst_14 = arith.constant 1.280000e+02 : f32
    %26 = vector.broadcast %cst_14 : f32 to vector<16x1xf32>
    %27 = arith.divf %25, %26 : vector<16x1xf32>
    %28 = vector.broadcast %20 : vector<16x1xf32> to vector<16x128xf32>
    %29 = arith.subf %16, %28 : vector<16x128xf32>
    %cst_15 = arith.constant 9.99999974E-6 : f32
    %30 = vector.broadcast %cst_15 : f32 to vector<16x1xf32>
    %31 = arith.addf %27, %30 : vector<16x1xf32>
    %32 = math.rsqrt %31 : vector<16x1xf32>
    %33 = vector.broadcast %32 : vector<16x1xf32> to vector<16x128xf32>
    %34 = arith.mulf %29, %33 : vector<16x128xf32>
    %c0_16 = arith.constant 0 : index
    %c0_17 = arith.constant 0 : index
    %35 = vector.load %arg6[%c0_16, %c0_17] : memref<1x128xf32, #tpu.memory_space<vmem>>, vector<1x128xf32>
    %36 = vector.broadcast %35 : vector<1x128xf32> to vector<16x128xf32>
    %37 = arith.mulf %34, %36 : vector<16x128xf32>
    %c0_18 = arith.constant 0 : index
    %c0_19 = arith.constant 0 : index
    %38 = vector.load %arg7[%c0_18, %c0_19] : memref<1x128xf32, #tpu.memory_space<vmem>>, vector<1x128xf32>
    %39 = vector.broadcast %38 : vector<1x128xf32> to vector<16x128xf32>
    %40 = arith.addf %37, %39 : vector<16x128xf32>
    %c0_20 = arith.constant 0 : index
    %c0_21 = arith.constant 0 : index
    %41 = vector.load %arg8[%c0_20, %c0_21] : memref<16x128xf32, #tpu.memory_space<vmem>>, vector<16x128xf32>
    tpu.vector_store %arg8[%c0_20, %c0_21], %40 {strides = array<i32>} : memref<16x128xf32, #tpu.memory_space<vmem>>, vector<16x128xf32>,
    return
  }
  func.func @transform_0(%arg0: i32) -> (i32, i32) {
    %c0_i32 = arith.constant 0 : i32
    %c0_i32_0 = arith.constant 0 : i32
    return %arg0, %c0_i32 : i32, i32
  }
  func.func @transform_1(%arg0: i32) -> (i32, i32) {
    %c0_i32 = arith.constant 0 : i32
    %c0_i32_0 = arith.constant 0 : i32
    %c0_i32_1 = arith.constant 0 : i32
    return %c0_i32, %c0_i32_0 : i32, i32
  }
  func.func @transform_2(%arg0: i32) -> (i32, i32) {
    %c0_i32 = arith.constant 0 : i32
    %c0_i32_0 = arith.constant 0 : i32
    %c0_i32_1 = arith.constant 0 : i32
    return %c0_i32, %c0_i32_0 : i32, i32
  }
  func.func @transform_3(%arg0: i32) -> (i32, i32) {
    %c0_i32 = arith.constant 0 : i32
    %c0_i32_0 = arith.constant 0 : i32
    %c0_i32_1 = arith.constant 0 : i32
    return %c0_i32, %c0_i32_0 : i32, i32
  }
  func.func @transform_4(%arg0: i32) -> (i32, i32) {
    %c0_i32 = arith.constant 0 : i32
    %c0_i32_0 = arith.constant 0 : i32
    %c0_i32_1 = arith.constant 0 : i32
    return %c0_i32, %c0_i32_0 : i32, i32
  }
  func.func @transform_5(%arg0: i32) -> (i32, i32) {
    %c0_i32 = arith.constant 0 : i32
    %c0_i32_0 = arith.constant 0 : i32
    %c0_i32_1 = arith.constant 0 : i32
    return %c0_i32, %c0_i32_0 : i32, i32
  }
  func.func @transform_6(%arg0: i32) -> (i32, i32) {
    %c0_i32 = arith.constant 0 : i32
    %c0_i32_0 = arith.constant 0 : i32
    %c0_i32_1 = arith.constant 0 : i32
    return %c0_i32, %c0_i32_0 : i32, i32
  }
  func.func @transform_7(%arg0: i32) -> (i32, i32) {
    %c0_i32 = arith.constant 0 : i32
    %c0_i32_0 = arith.constant 0 : i32
    return %arg0, %c0_i32 : i32, i32
  }
}

</mosaic_0001>

<bundles_post_ra>
// kernel: tpu_custom_call.1
= control target key start
LH: loop header
LB: loop body
LE: loop exit
PB: predicated region body
PF: predicated region fallthrough
CT: control target
= control target key end

     0   :  { %12 = vsyncpa [#allocation3], 0  ;;  %s722_s0 = inlined_call_operand.hbm [shape: bf16[16,128], index: 0, kind: input, shape index: {}]   ;;  %s723_s1 = inlined_call_operand.hbm [shape: bf16[128,256], index: 1, kind: input, shape index: {}]   ;;  %s724_s2 = inlined_call_operand.vmem [shape: f32[1,256], index: 2, kind: input, shape index: {}]   ;;  %s725_s3 = inlined_call_operand.hbm [shape: bf16[128,128], index: 3, kind: input, shape index: {}]   ;;  %s726_s4 = inlined_call_operand.vmem [shape: f32[1,128], index: 4, kind: input, shape index: {}]   ;;  %s727_s5 = inlined_call_operand.vmem [shape: f32[1,128], index: 5, kind: input, shape index: {}]   ;;  %s728_s6 = inlined_call_operand.vmem [shape: f32[1,128], index: 6, kind: input, shape index: {}]   ;;  %s729_s7 = inlined_call_operand.hbm [shape: f32[16,128], index: 7, kind: output, shape index: {}]  }
   0x1   :  { %13 = vsyncpa [#allocation6], 0 }
   0x2   :  { %14 = vsyncpa [#allocation4], 0  ;;  %s605_s24 = smov [#allocation5]   ;;  %s511_s28 = scalar_lea.hbm %s723_s1, 2048 }
   0x3   :  { %s32_s25 = sshll.u32 %s605_s24, 4  ;;  %p512_p0 = scmp.ne.s32.totalorder %s723_s1, %s511_s28  ;;  %s33_s25 = int_to_ptr.vmem [resolvable:$true] %s32_s25 }
   0x4   :  { %p515_p1 = scmp.lt.u32.totalorder %s511_s28, %s723_s1 }
   0x6   :  { %p517_p2 = pnand %p515_p1, %p512_p0 }
   0x8   :  { %520 = shalt.err (!%p517_p2)
}
   0x9   :  { %s521_s10 = scalar_lea.vmem %s33_s25, 2048  ;;  %p526_p4 = scmp.lt.s32.totalorder %s33_s25, %s33_s25 }
   0xa   :  { %p522_p3 = scmp.ne.s32.totalorder %s33_s25, %s521_s10  ;;  %p527_p5 = scmp.lt.s32.totalorder %s521_s10, %s521_s10 }
   0xc   :  { %p528_p6 = por %p527_p5, %p526_p4 }
   0xe   :  { %p529_p7 = pnand %p528_p6, %p522_p3 }
  0x10   :  { %532 = shalt.err (!%p529_p7)
}
  0x11   :  { %s606_s11 = smov 128   ;;  %s607_s12 = smov 8  }
  0x12   :  { %38 = dma.hbm_to_vmem [thread:$0]  %s723_s1, 2048, %s33_s25, [#allocation6], %s606_s11, %s606_s11, %s607_s12  }
  0x13   :  { %s608_s15 = smov [#allocation2]   ;;  %s533_s19 = scalar_lea.hbm %s722_s0, 128 }
  0x14   :  { %s20_s16 = sshll.u32 %s608_s15, 4  ;;  %p534_p8 = scmp.ne.s32.totalorder %s722_s0, %s533_s19  ;;  %s21_s16 = int_to_ptr.vmem [resolvable:$true] %s20_s16 }
  0x15   :  { %p537_p9 = scmp.lt.u32.totalorder %s533_s19, %s722_s0 }
  0x17   :  { %p539_p10 = pnand %p537_p9, %p534_p8 }
  0x19   :  { %542 = shalt.err (!%p539_p10)
}
  0x1a   :  { %s543_s24 = scalar_lea.vmem %s21_s16, 128  ;;  %p548_p12 = scmp.lt.s32.totalorder %s21_s16, %s21_s16 }
  0x1b   :  { %p544_p11 = scmp.ne.s32.totalorder %s21_s16, %s543_s24  ;;  %p549_p13 = scmp.lt.s32.totalorder %s543_s24, %s543_s24 }
  0x1d   :  { %p550_p0 = por %p549_p13, %p548_p12 }
  0x1f   :  { %p551_p1 = pnand %p550_p0, %p544_p11 }
  0x21   :  { %554 = shalt.err (!%p551_p1)
}
  0x22   :  { %s609_s1 = smov 64   ;;  %s610_s25 = smov 4  }
  0x23   :  { %26 = dma.hbm_to_vmem [thread:$0]  %s722_s0, 128, %s21_s16, [#allocation3], %s609_s1, %s609_s1, %s610_s25  }
  0x24   :  { %s611_s28 = smov [#allocation7]   ;;  %s555_s9 = scalar_lea.hbm %s725_s3, 1024 }
  0x25   :  { %s46_s29 = sshll.u32 %s611_s28, 4  ;;  %p556_p2 = scmp.ne.s32.totalorder %s725_s3, %s555_s9  ;;  %s47_s29 = int_to_ptr.vmem [resolvable:$true] %s46_s29 }
  0x26   :  { %p559_p3 = scmp.lt.u32.totalorder %s555_s9, %s725_s3 }
  0x28   :  { %p561_p4 = pnand %p559_p3, %p556_p2 }
  0x2a   :  { %564 = shalt.err (!%p561_p4)
}
  0x2b   :  { %s565_s17 = scalar_lea.vmem %s47_s29, 1024  ;;  %p570_p6 = scmp.lt.s32.totalorder %s47_s29, %s47_s29 }
  0x2c   :  { %p566_p5 = scmp.ne.s32.totalorder %s47_s29, %s565_s17  ;;  %p571_p7 = scmp.lt.s32.totalorder %s565_s17, %s565_s17 }
  0x2e   :  { %p572_p8 = por %p571_p7, %p570_p6 }
  0x30   :  { %p573_p9 = pnand %p572_p8, %p566_p5 }
  0x32   :  { %576 = shalt.err (!%p573_p9)
}
  0x33   :  { %52 = dma.hbm_to_vmem [thread:$0]  %s725_s3, 1024, %s47_s29, [#allocation6], %s609_s1, %s609_s1, %s610_s25  }
  0x34   :  { %599 = dma.done.wait [#allocation3], 128  }
  0x35   :  { %600 = vsyncadd [#allocation3], 4294967168 }
  0x36   :  { %601 = dma.done.wait [#allocation6], 3072  }
  0x37   :  { %602 = vsyncadd [#allocation6], 4294964224  ;;  %v612_v0 = vmov 0   ;;  %v613_v1 = vmov 0.0   ;;  %v474_v2 = vld [vmem:[#allocation5 + $0x4] ss:$8 sps:$4 sm:$0xff]   ;;  %v89_v27 = vlaneseq }
  0x38   :  { %217 = vmatprep.mubr.bf16.mxu0 %v612_v0  ;;  %443 = vmatprep.subr.bf16.mxu1 %v613_v1  ;;  %v476_v3 = vld [vmem:[#allocation5] ss:$8 sps:$4 sm:$0xff]   ;;  %v477_v4 = vld [vmem:[#allocation5 + $0x14] ss:$8 sps:$4 sm:$0xff]   ;;  %v479_v5 = vld [vmem:[#allocation5 + $0x10] ss:$8 sps:$4 sm:$0xff]  }
  0x39   :  { %185 = vmatprep.subr.bf16.mxu0 %v474_v2  ;;  %v480_v6 = vld [vmem:[#allocation5 + $0x24] ss:$8 sps:$4 sm:$0xff]   ;;  %v482_v7 = vld [vmem:[#allocation5 + $0x20] ss:$8 sps:$4 sm:$0xff]   ;;  %v483_v8 = vld [vmem:[#allocation5 + $0x34] ss:$8 sps:$4 sm:$0xff]  }
  0x3a   :  { %186 = vmatpush1.bf16.msra.mxu0 %v476_v3  ;;  %v485_v9 = vld [vmem:[#allocation5 + $0x30] ss:$8 sps:$4 sm:$0xff]   ;;  %v486_v10 = vld [vmem:[#allocation5 + $0x44] ss:$8 sps:$4 sm:$0xff]   ;;  %v488_v13 = vld [vmem:[#allocation5 + $0x40] ss:$8 sps:$4 sm:$0xff]  }
  0x3b   :  { %187 = vmatprep.subr.bf16.mxu0 %v477_v4  ;;  %v499_v11 = vld [vmem:[#allocation7] sm:$0xff]   ;;  %v500_v12 = vld [vmem:[#allocation7 + $0x8] sm:$0xff]   ;;  %v489_v14 = vld [vmem:[#allocation5 + $0x54] ss:$8 sps:$4 sm:$0xff]   ;;  %vm614_vm0 = vmmov 0   ;;  %v90_v28 = vshrl.u32 %v89_v27, 7 }
  0x3c   :  { %444 = vmatpush3.bf16.msra.mxu1 %v499_v11  ;;  %v501_v15 = vld [vmem:[#allocation7 + $0x10] sm:$0xff]   ;;  %v492_v17 = vld [vmem:[#allocation5 + $0x64] ss:$8 sps:$4 sm:$0xff]   ;;  %v502_v18 = vld [vmem:[#allocation7 + $0x18] sm:$0xff]   ;;  %459 = vmatprep.mubr.msk.bf16.mxu1 %vm614_vm0, %v613_v1  ;;  %s615_s23 = smov [#allocation8]  }
  0x3d   :  { %445 = vmatprep.subr.bf16.mxu1 %v613_v1  ;;  %v491_v16 = vld [vmem:[#allocation5 + $0x50] ss:$8 sps:$4 sm:$0xff]   ;;  %v494_v19 = vld [vmem:[#allocation5 + $0x60] ss:$8 sps:$4 sm:$0xff]   ;;  %v495_v20 = vld [vmem:[#allocation5 + $0x74] ss:$8 sps:$4 sm:$0xff]  }
  0x3e   :  { %188 = vmatpush1.bf16.msra.mxu0 %v479_v5  ;;  %v503_v21 = vld [vmem:[#allocation7 + $0x20] sm:$0xff]   ;;  %v497_v22 = vld [vmem:[#allocation5 + $0x70] ss:$8 sps:$4 sm:$0xff]   ;;  %v504_v24 = vld [vmem:[#allocation7 + $0x28] sm:$0xff]   ;;  %v91_v29 = vsub.s32 0, %v90_v28  ;;  %v95_v41 = vsub.s32 1, %v90_v28 }
  0x3f   :  { %189 = vmatprep.subr.bf16.mxu0 %v480_v6  ;;  %v498_v23 = vld [vmem:[#allocation2] sm:$0xff]   ;;  %v505_v25 = vld [vmem:[#allocation7 + $0x30] sm:$0xff]   ;;  %s393_s24 = sshll.u32 %s615_s23, 4  ;;  %s394_s24 = int_to_ptr.vmem [resolvable:$true] %s393_s24 }
  0x40   :  { %446 = vmatpush3.bf16.msra.mxu1 %v500_v12  ;;  %v506_v26 = vld [vmem:[#allocation7 + $0x38] sm:$0xff]   ;;  %s577_s1 = scalar_lea.vmem %s394_s24, 256  ;;  %p582_p11 = scmp.lt.s32.totalorder %s394_s24, %s394_s24 }
  0x41   :  { %447 = vmatprep.subr.bf16.mxu1 %v613_v1  ;;  %v87_v30 = vld [vmem:[%s724_s2] sm:$0x3]  ;;  %p578_p10 = scmp.ne.s32.totalorder %s394_s24, %s577_s1  ;;  %p583_p12 = scmp.lt.s32.totalorder %s577_s1, %s577_s1 }
  0x42   :  { %190 = vmatpush1.bf16.msra.mxu0 %v482_v7  ;;  %v92_v31 = vrot.slane %v87_v30, %v91_v29  ;;  %v96_v42 = vrot.slane %v87_v30, %v95_v41  ;;  %v423_v43 = vld [vmem:[%s726_s4] ss:$0 sm:$0xff] }
  0x43   :  { %191 = vmatprep.subr.bf16.mxu0 %v483_v8  ;;  %v432_v5 = vld [vmem:[%s727_s5] ss:$0 sm:$0xff]  ;;  %p584_p13 = por %p583_p12, %p582_p11 }
  0x44   :  { %448 = vmatpush3.bf16.msra.mxu1 %v501_v15  ;;  %v433_v7 = vld [vmem:[%s728_s6] ss:$0 sm:$0xff] }
  0x45   :  { %449 = vmatprep.subr.bf16.mxu1 %v613_v1  ;;  %p585_p0 = pnand %p584_p13, %p578_p10 }
  0x46   :  { %192 = vmatpush1.bf16.msra.mxu0 %v485_v9 }
  0x47   :  { %193 = vmatprep.subr.bf16.mxu0 %v486_v10 }
  0x48   :  { %450 = vmatpush3.bf16.msra.mxu1 %v502_v18 }
  0x49   :  { %451 = vmatprep.subr.bf16.mxu1 %v613_v1 }
  0x4a   :  { %194 = vmatpush1.bf16.msra.mxu0 %v488_v13 }
  0x4b   :  { %195 = vmatprep.subr.bf16.mxu0 %v489_v14 }
  0x4c   :  { %452 = vmatpush3.bf16.msra.mxu1 %v503_v21 }
  0x4d   :  { %453 = vmatprep.subr.bf16.mxu1 %v613_v1 }
  0x4e   :  { %196 = vmatpush1.bf16.msra.mxu0 %v491_v16 }
  0x4f   :  { %197 = vmatprep.subr.bf16.mxu0 %v492_v17 }
  0x50   :  { %454 = vmatpush3.bf16.msra.mxu1 %v504_v24 }
  0x51   :  { %455 = vmatprep.subr.bf16.mxu1 %v613_v1 }
  0x52   :  { %198 = vmatpush1.bf16.msra.mxu0 %v494_v19 }
  0x53   :  { %199 = vmatprep.subr.bf16.mxu0 %v495_v20 }
  0x54   :  { %456 = vmatpush3.bf16.msra.mxu1 %v505_v25 }
  0x55   :  { %457 = vmatprep.subr.bf16.mxu1 %v613_v1 }
  0x56   :  { %200 = vmatpush1.bf16.msra.mxu0 %v497_v22 }
  0x58   :  { %458 = vmatpush3.bf16.msra.mxu1 %v506_v26 }
  0x59   :  { %218 = vmatmul.mubr.bf16.vlgmr.msra.gmra.mrb[0].mxu0 %v498_v23 }
 0x12c   :  { %v219_v32 = vpop.f32.mrb[0].mxu0 }
 0x12d   :  { %v220_v33 = vadd.f32 %v219_v32, %v92_v31  ;;  %v221_v34 = vpop.f32.mrb[1].mxu0 }
 0x12e   :  { %v223_v35 = vpop.f32.mrb[2].mxu0  ;;  %v222_v45 = vadd.f32 %v221_v34, %v96_v42 }
 0x12f   :  { %v224_v36 = vadd.f32 %v223_v35, %v92_v31  ;;  %v225_v37 = vpop.f32.mrb[3].mxu0  ;;  %v228_v38 = vmax.f32 %v220_v33, 0.0 }
 0x130   :  { %v226_v49 = vadd.f32 %v225_v37, %v96_v42 }
 0x131   :  { %v229_v39 = vmax.f32 %v224_v36, 0.0 }
 0x133   :  { %v230_v40 = vpack.c.bf16 %v229_v39, %v228_v38 }
 0x135   :  { %460 = vmatmul.mubr.bf16.vlgmr.msra.gmra.mrb[0].mxu1 %v230_v40 }
 0x208   :  { %v336_v44 = vpop.f32.mrb[0].mxu1 }
 0x209   :  { %v337_v46 = vadd.f32 %v423_v43, %v336_v44  ;;  %v461_v47 = vpop.f32.mrb[1].mxu1 }
 0x20a   :  { %v339_v48 = vpop.f32.mrb[2].mxu1 }
 0x20b   :  { %v340_v50 = vadd.f32 %v423_v43, %v339_v48  ;;  %v462_v51 = vpop.f32.mrb[3].mxu1  ;;  %v343_v52 = vadd.f32 %v337_v46, %v222_v45 }
 0x20d   :  { %345 = vadd.xlane.f32.xlu0 %v343_v52  ;;  %v344_v53 = vadd.f32 %v340_v50, %v226_v49 }
 0x211   :  { %347 = vadd.xlane.f32.xlu0 %v344_v53 }
 0x29a   :  { %v346_v54 = vpop.xlane.xlu0 %345 }
 0x29b   :  { %v350_v55 = vmul.f32 0.0078125, %v346_v54 }
 0x29d   :  { %v352_v56 = vsub.f32 %v343_v52, %v350_v55 }
 0x29e   :  { %v348_v57 = vpop.xlane.xlu0 %347 }
 0x29f   :  { %v351_v58 = vmul.f32 0.0078125, %v348_v57  ;;  %v354_v59 = vmul.f32 %v352_v56, %v352_v56 }
 0x2a1   :  { %v353_v60 = vsub.f32 %v344_v53, %v351_v58  ;;  %356 = vadd.xlane.f32.xlu1 %v354_v59 }
 0x2a3   :  { %v355_v61 = vmul.f32 %v353_v60, %v353_v60 }
 0x2a5   :  { %358 = vadd.xlane.f32.xlu1 %v355_v61 }
 0x32e   :  { %v357_v62 = vpop.xlane.xlu1 %356 }
 0x32f   :  { %v360_v63 = vmul.f32 0.0078125, %v357_v62 }
 0x331   :  { %v362_v0 = vadd.f32 1e-05, %v360_v63 }
 0x332   :  { %v359_v1 = vpop.xlane.xlu1 %358 }
 0x333   :  { %507 = vrsqrt.f32 %v362_v0  ;;  %v361_v2 = vmul.f32 0.0078125, %v359_v1 }
 0x335   :  { %v363_v3 = vadd.f32 1e-05, %v361_v2 }
 0x337   :  { %509 = vrsqrt.f32 %v363_v3 }
 0x33d   :  { %v508_v4 = vpop.eup %507 }
 0x33e   :  { %v366_v6 = vmul.f32 %v508_v4, %v352_v56 }
 0x340   :  { %v375_v8 = vmul.f32 %v432_v5, %v366_v6 }
 0x341   :  { %v510_v9 = vpop.eup %509 }
 0x342   :  { %v367_v10 = vmul.f32 %v510_v9, %v353_v60  ;;  %v384_v11 = vadd.f32 %v433_v7, %v375_v8 }
 0x344   :  { %v376_v12 = vmul.f32 %v432_v5, %v367_v10  ;;  %386 = vst [vmem:[#allocation8] sm:$0xff] %v384_v11 }
 0x346   :  { %v385_v13 = vadd.f32 %v433_v7, %v376_v12 }
 0x348   :  { %387 = vst [vmem:[#allocation8 + $0x8] sm:$0xff] %v385_v13 }
 0x349   :  { %588 = shalt.err (!%p585_p0)
}
 0x34a   :  { %s589_s25 = scalar_lea.hbm %s729_s7, 256 }
 0x34b   :  { %p590_p1 = scmp.ne.s32.totalorder %s729_s7, %s589_s25  ;;  %p593_p2 = scmp.lt.u32.totalorder %s589_s25, %s729_s7 }
 0x34d   :  { %p595_p3 = pnand %p593_p2, %p590_p1 }
 0x34f   :  { %598 = shalt.err (!%p595_p3)
}
 0x350   :  { %399 = dma.vmem_to_hbm [thread:$0]  %s394_s24, 256, %s729_s7, [#allocation4], %s606_s11, %s606_s11, %s607_s12  }
 0x351   :  { %603 = dma.done.wait [#allocation4], 256  }
 0x352   :  { %604 = vsyncadd [#allocation4], 4294967040 }
 0x353   :  { %403 = vsyncpa [#allocation3], 1 }
 0x354   :  { %404 = vsyncpa [#allocation6], 1 }
 0x355   :  { %405 = vsyncpa [#allocation4], 1 }

</bundles_post_ra>
